<compile_context>
chip_gen: v7x
topology: tpu7x:2x2x1
jax: 0.10.0
libtpu: 0.0.40
codegen_flags: <defaults>
</compile_context>

<pallas_src>
import functools

import jax
import jax.numpy as jnp
from jax.experimental import pallas as pl
from jax.experimental.pallas import tpu as pltpu


def _qnet_kernel(xT_ref, w1_ref, b1_ref, w2_ref, b2_ref, w3_ref, b3_ref, oT_ref):
    # Layer 1: (fc, state) @ (state, tb) -> (fc, tb).  Inputs stay in their native
    # dtype (bf16 path uses the bf16 MXU); accumulation is f32.
    h = jnp.dot(w1_ref[...], xT_ref[...], preferred_element_type=jnp.float32)
    h = jnp.maximum(h + b1_ref[...].astype(jnp.float32), 0.0)
    # Layer 2: activations stay f32 between layers (accuracy; elementwise on VPU in f32).
    h = jnp.dot(w2_ref[...].astype(jnp.float32), h, preferred_element_type=jnp.float32)
    h = jnp.maximum(h + b2_ref[...].astype(jnp.float32), 0.0)
    # Layer 3 (no activation).
    o = jnp.dot(w3_ref[...].astype(jnp.float32), h, preferred_element_type=jnp.float32)
    o = o + b3_ref[...].astype(jnp.float32)
    oT_ref[...] = o.astype(oT_ref.dtype)  # lane-dense store (last dim = batch tile)


def _round_down(x, m):
    return (x // m) * m


@functools.partial(jax.jit, static_argnames=("block_batch",))
def qnetwork_forward(x, w1, b1, w2, b2, w3, b3, *, block_batch=2048):
    """QNetwork forward. x: (batch, state_size); weights PyTorch-native [out, in];
    biases [out, 1]. Returns (batch, action_size) q-values in x.dtype."""
    batch, state_size = x.shape
    fc_size, s_in = w1.shape
    action_size = w3.shape[0]
    # Layout guards (PyTorch-native [out, in] is required; [in, out] would silently
    # compute the wrong thing).
    assert s_in == state_size, "w1 must be [fc_size, state_size] (PyTorch layout)"
    assert w2.shape == (fc_size, fc_size), "w2 must be [fc_size, fc_size]"
    assert w3.shape == (action_size, fc_size), "w3 must be [action_size, fc_size]"
    assert b1.shape == (fc_size, 1) and b2.shape == (fc_size, 1)
    assert b3.shape == (action_size, 1)

    out_dtype = x.dtype

    # Feature-major input (state_size, batch). Cheap XLA transpose: at these shapes
    # the kernel is MXU-push-bound, not HBM-bound.
    xT = x.T

    # Batch tile (lane axis). Small batches: one full-array tile (always layout-legal).
    # Large batches: multiple of 128 lanes, capped at block_batch and at batch//2 so
    # the grid has >= 2 steps (keeps v7x's second TensorCore busy).
    if batch <= 256:
        tb = batch
    else:
        tb = min(block_batch, max(128, _round_down(batch // 2, 128)))
    grid = (pl.cdiv(batch, tb),)

    # Advisory cost estimate (actual output dtype, no padded rows).
    flops = 2 * batch * (
        state_size * fc_size + fc_size * fc_size + fc_size * action_size
    )
    bytes_accessed = (
        batch * state_size * x.dtype.itemsize
        + batch * action_size * jnp.dtype(out_dtype).itemsize
        + sum(int(a.size) * a.dtype.itemsize for a in (w1, b1, w2, b2, w3, b3))
    )
    cost = pl.CostEstimate(
        flops=int(flops), transcendentals=0, bytes_accessed=int(bytes_accessed)
    )

    in_specs = [
        # x^T: pipelined (double-buffered) along the batch/lane axis.
        pl.BlockSpec((state_size, tb), lambda i: (0, i)),
        # Weights/biases: constant index_map -> loaded once, VMEM-resident across the
        # grid. (If fc_size ever grows beyond toy sizes, add
        # pipeline_mode=pl.Buffered(1) here to drop the redundant second buffer.)
        pl.BlockSpec((fc_size, state_size), lambda i: (0, 0)),   # w1 [out, in]
        pl.BlockSpec((fc_size, 1), lambda i: (0, 0)),            # b1 [out, 1]
        pl.BlockSpec((fc_size, fc_size), lambda i: (0, 0)),      # w2
        pl.BlockSpec((fc_size, 1), lambda i: (0, 0)),            # b2
        pl.BlockSpec((action_size, fc_size), lambda i: (0, 0)),  # w3
        pl.BlockSpec((action_size, 1), lambda i: (0, 0)),        # b3
    ]
    out_spec = pl.BlockSpec((action_size, tb), lambda i: (0, i))

    oT = pl.pallas_call(
        _qnet_kernel,
        out_shape=jax.ShapeDtypeStruct((action_size, batch), out_dtype),
        grid_spec=pltpu.PrefetchScalarGridSpec(
            num_scalar_prefetch=0,
            grid=grid,
            in_specs=in_specs,
            out_specs=out_spec,
        ),
        compiler_params=pltpu.CompilerParams(
            # Batch tiles are independent -> megacore-shard on v7x (no-op on v5e/v6e).
            dimension_semantics=("parallel",),
            # Comfortable headroom below v7x's 64 MiB physical VMEM; actual footprint
            # at these shapes is ~1 MiB, so this never drives the tile choice.
            vmem_limit_bytes=48 * 1024 * 1024,
        ),
        cost_estimate=cost,
    )(xT, w1, b1, w2, b2, w3, b3)

    # Back to the PyTorch (batch, action_size) convention; tiny (action_size x batch)
    # transpose handled by XLA.
    return oT.T


def init_params(key, state_size, action_size, fc_size, dtype=jnp.float32):
    """nn.Linear-style init, PyTorch-native layout: W=[out, in], b=[out, 1]."""
    def linear_init(k, fan_in, fan_out):
        k_w, k_b = jax.random.split(k)
        bound = 1.0 / jnp.sqrt(fan_in)
        w = jax.random.uniform(k_w, (fan_out, fan_in), jnp.float32, -bound, bound)
        b = jax.random.uniform(k_b, (fan_out, 1), jnp.float32, -bound, bound)
        return w.astype(dtype), b.astype(dtype)

    k1, k2, k3 = jax.random.split(key, 3)
    w1, b1 = linear_init(k1, state_size, fc_size)
    w2, b2 = linear_init(k2, fc_size, fc_size)
    w3, b3 = linear_init(k3, fc_size, action_size)
    return w1, b1, w2, b2, w3, b3


def _ref_forward(x, w1, b1, w2, b2, w3, b3):
    h = jnp.maximum(x @ w1.T + b1[:, 0], 0.0)
    h = jnp.maximum(h @ w2.T + b2[:, 0], 0.0)
    return h @ w3.T + b3[:, 0]


# TODO(synk): get_greedy_action_from_state / get_norm are host-side epsilon-greedy /
# parameter-norm utilities, not part of the forward pass, and are not kernelized.

if __name__ == "__main__":
    # Small shapes consistent with the module: state vector in, Q-values out.
    batch = 8
    state_size = 8
    action_size = 4
    fc_size = 64  # module default

    key = jax.random.PRNGKey(0)
    k_x, k_p = jax.random.split(key)

    x = jax.random.normal(k_x, (batch, state_size), jnp.float32)
    params = init_params(k_p, state_size, action_size, fc_size)

    # 1) Small-batch f32 check (single full-array tile).
    out = qnetwork_forward(x, *params)
    jax.block_until_ready(out)
    ref = _ref_forward(x, *params)
    assert out.shape == (batch, action_size)
    assert jnp.allclose(out, ref, atol=1e-5, rtol=1e-5)

    # 2) Multi-tile grid (tb=128, grid=3) with a ragged final block (300 % 128 != 0),
    #    no jnp.pad / no tb-rounding — Pallas masks the boundary block.
    batch2 = 300
    x2 = jax.random.normal(jax.random.PRNGKey(1), (batch2, state_size), jnp.float32)
    out2 = qnetwork_forward(x2, *params)
    jax.block_until_ready(out2)
    ref2 = _ref_forward(x2, *params)
    assert out2.shape == (batch2, action_size)
    assert jnp.allclose(out2, ref2, atol=1e-5, rtol=1e-5)

    # 3) bf16 inputs/weights: bf16 MXU for layer 1, f32 activations between layers,
    #    bf16 lane-dense output (output dtype follows x.dtype).
    x2_bf16 = x2.astype(jnp.bfloat16)
    params_bf16 = tuple(p.astype(jnp.bfloat16) for p in params)
    out3 = qnetwork_forward(x2_bf16, *params_bf16)
    jax.block_until_ready(out3)
    assert out3.shape == (batch2, action_size)
    assert out3.dtype == jnp.bfloat16
    assert jnp.allclose(out3.astype(jnp.float32), ref2, atol=1e-1, rtol=1e-1)

    print("KERNEL_OK")
</pallas_src>

<mosaic_0001>
module attributes {stable_mosaic.version = 11 : i64} {
  func.func @_qnet_kernel(%arg0: i32, %arg1: memref<8x8xf32, #tpu.memory_space<vmem>>, %arg2: memref<64x8xf32, #tpu.memory_space<vmem>>, %arg3: memref<64x1xf32, #tpu.memory_space<vmem>>, %arg4: memref<64x64xf32, #tpu.memory_space<vmem>>, %arg5: memref<64x1xf32, #tpu.memory_space<vmem>>, %arg6: memref<4x64xf32, #tpu.memory_space<vmem>>, %arg7: memref<4x1xf32, #tpu.memory_space<vmem>>, %arg8: memref<4x8xf32, #tpu.memory_space<vmem>>) attributes {dimension_semantics = [#tpu.dimension_semantics<parallel>], iteration_bounds = array<i64: 1>, scalar_prefetch = 0 : i64, scratch_operands = 0 : i64, tpu.core_type = #tpu.core_type<tc>, window_params = [{transform_indices = @transform_0, window_bounds = array<i64: 8, 8>}, {pipeline_mode = #tpu.pipeline_mode<synchronous>, transform_indices = @transform_1, window_bounds = array<i64: 64, 8>}, {pipeline_mode = #tpu.pipeline_mode<synchronous>, transform_indices = @transform_2, window_bounds = array<i64: 64, 1>}, {pipeline_mode = #tpu.pipeline_mode<synchronous>, transform_indices = @transform_3, window_bounds = array<i64: 64, 64>}, {pipeline_mode = #tpu.pipeline_mode<synchronous>, transform_indices = @transform_4, window_bounds = array<i64: 64, 1>}, {pipeline_mode = #tpu.pipeline_mode<synchronous>, transform_indices = @transform_5, window_bounds = array<i64: 4, 64>}, {pipeline_mode = #tpu.pipeline_mode<synchronous>, transform_indices = @transform_6, window_bounds = array<i64: 4, 1>}, {transform_indices = @transform_7, window_bounds = array<i64: 4, 8>}]} {
    %c0 = arith.constant 0 : index
    %c0_0 = arith.constant 0 : index
    %0 = vector.load %arg2[%c0, %c0_0] : memref<64x8xf32, #tpu.memory_space<vmem>>, vector<64x8xf32>
    %c0_1 = arith.constant 0 : index
    %c0_2 = arith.constant 0 : index
    %1 = vector.load %arg1[%c0_1, %c0_2] : memref<8x8xf32, #tpu.memory_space<vmem>>, vector<8x8xf32>
    %cst = arith.constant dense<0.000000e+00> : vector<64x8xf32>
    %2 = tpu.matmul %0, %1, %cst {dimension_numbers = #tpu.dot_dimension_numbers<[1], [0], [0], [1], [0, 0, 1, 1], [], []>} : vector<64x8xf32>, vector<8x8xf32>, vector<64x8xf32> -> vector<64x8xf32>
    %c0_3 = arith.constant 0 : index
    %c0_4 = arith.constant 0 : index
    %3 = vector.load %arg3[%c0_3, %c0_4] : memref<64x1xf32, #tpu.memory_space<vmem>>, vector<64x1xf32>
    %4 = vector.broadcast %3 : vector<64x1xf32> to vector<64x8xf32>
    %5 = arith.addf %2, %4 : vector<64x8xf32>
    %cst_5 = arith.constant 0.000000e+00 : f32
    %6 = vector.broadcast %cst_5 : f32 to vector<64x8xf32>
    %7 = arith.maximumf %5, %6 : vector<64x8xf32>
    %c0_6 = arith.constant 0 : index
    %c0_7 = arith.constant 0 : index
    %8 = vector.load %arg4[%c0_6, %c0_7] : memref<64x64xf32, #tpu.memory_space<vmem>>, vector<64x64xf32>
    %cst_8 = arith.constant dense<0.000000e+00> : vector<64x8xf32>
    %9 = tpu.matmul %8, %7, %cst_8 {dimension_numbers = #tpu.dot_dimension_numbers<[1], [0], [0], [1], [0, 0, 1, 1], [], []>} : vector<64x64xf32>, vector<64x8xf32>, vector<64x8xf32> -> vector<64x8xf32>
    %c0_9 = arith.constant 0 : index
    %c0_10 = arith.constant 0 : index
    %10 = vector.load %arg5[%c0_9, %c0_10] : memref<64x1xf32, #tpu.memory_space<vmem>>, vector<64x1xf32>
    %11 = vector.broadcast %10 : vector<64x1xf32> to vector<64x8xf32>
    %12 = arith.addf %9, %11 : vector<64x8xf32>
    %cst_11 = arith.constant 0.000000e+00 : f32
    %13 = vector.broadcast %cst_11 : f32 to vector<64x8xf32>
    %14 = arith.maximumf %12, %13 : vector<64x8xf32>
    %c0_12 = arith.constant 0 : index
    %c0_13 = arith.constant 0 : index
    %15 = vector.load %arg6[%c0_12, %c0_13] : memref<4x64xf32, #tpu.memory_space<vmem>>, vector<4x64xf32>
    %cst_14 = arith.constant dense<0.000000e+00> : vector<4x8xf32>
    %16 = tpu.matmul %15, %14, %cst_14 {dimension_numbers = #tpu.dot_dimension_numbers<[1], [0], [0], [1], [0, 0, 1, 1], [], []>} : vector<4x64xf32>, vector<64x8xf32>, vector<4x8xf32> -> vector<4x8xf32>
    %c0_15 = arith.constant 0 : index
    %c0_16 = arith.constant 0 : index
    %17 = vector.load %arg7[%c0_15, %c0_16] : memref<4x1xf32, #tpu.memory_space<vmem>>, vector<4x1xf32>
    %18 = vector.broadcast %17 : vector<4x1xf32> to vector<4x8xf32>
    %19 = arith.addf %16, %18 : vector<4x8xf32>
    %c0_17 = arith.constant 0 : index
    %c0_18 = arith.constant 0 : index
    %20 = vector.load %arg8[%c0_17, %c0_18] : memref<4x8xf32, #tpu.memory_space<vmem>>, vector<4x8xf32>
    tpu.vector_store %arg8[%c0_17, %c0_18], %19 {strides = array<i32>} : memref<4x8xf32, #tpu.memory_space<vmem>>, vector<4x8xf32>,
    return
  }
  func.func @transform_0(%arg0: i32) -> (i32, i32) {
    %c0_i32 = arith.constant 0 : i32
    %c0_i32_0 = arith.constant 0 : i32
    return %c0_i32, %arg0 : i32, i32
  }
  func.func @transform_1(%arg0: i32) -> (i32, i32) {
    %c0_i32 = arith.constant 0 : i32
    %c0_i32_0 = arith.constant 0 : i32
    %c0_i32_1 = arith.constant 0 : i32
    return %c0_i32, %c0_i32_0 : i32, i32
  }
  func.func @transform_2(%arg0: i32) -> (i32, i32) {
    %c0_i32 = arith.constant 0 : i32
    %c0_i32_0 = arith.constant 0 : i32
    %c0_i32_1 = arith.constant 0 : i32
    return %c0_i32, %c0_i32_0 : i32, i32
  }
  func.func @transform_3(%arg0: i32) -> (i32, i32) {
    %c0_i32 = arith.constant 0 : i32
    %c0_i32_0 = arith.constant 0 : i32
    %c0_i32_1 = arith.constant 0 : i32
    return %c0_i32, %c0_i32_0 : i32, i32
  }
  func.func @transform_4(%arg0: i32) -> (i32, i32) {
    %c0_i32 = arith.constant 0 : i32
    %c0_i32_0 = arith.constant 0 : i32
    %c0_i32_1 = arith.constant 0 : i32
    return %c0_i32, %c0_i32_0 : i32, i32
  }
  func.func @transform_5(%arg0: i32) -> (i32, i32) {
    %c0_i32 = arith.constant 0 : i32
    %c0_i32_0 = arith.constant 0 : i32
    %c0_i32_1 = arith.constant 0 : i32
    return %c0_i32, %c0_i32_0 : i32, i32
  }
  func.func @transform_6(%arg0: i32) -> (i32, i32) {
    %c0_i32 = arith.constant 0 : i32
    %c0_i32_0 = arith.constant 0 : i32
    %c0_i32_1 = arith.constant 0 : i32
    return %c0_i32, %c0_i32_0 : i32, i32
  }
  func.func @transform_7(%arg0: i32) -> (i32, i32) {
    %c0_i32 = arith.constant 0 : i32
    %c0_i32_0 = arith.constant 0 : i32
    return %c0_i32, %arg0 : i32, i32
  }
}

</mosaic_0001>

<bundles_post_ra>
// kernel: qnetwork_forward.1
= control target key start
LH: loop header
LB: loop body
LE: loop exit
PB: predicated region body
PF: predicated region fallthrough
CT: control target
= control target key end

     0   :  { %vm84_vm0 = vcmask 64512   ;;  %v683_v4 = vmov 0   ;;  %s862_s0 = inlined_call_operand.vmem [shape: f32[8,8], index: 0, kind: input, shape index: {}]   ;;  %s863_s1 = inlined_call_operand.vmem [shape: f32[64,8], index: 1, kind: input, shape index: {}]   ;;  %s864_s2 = inlined_call_operand.vmem [shape: f32[64,1], index: 2, kind: input, shape index: {}]   ;;  %s865_s3 = inlined_call_operand.vmem [shape: f32[64,64], index: 3, kind: input, shape index: {}]   ;;  %s866_s4 = inlined_call_operand.vmem [shape: f32[64,1], index: 4, kind: input, shape index: {}]   ;;  %s867_s5 = inlined_call_operand.vmem [shape: f32[4,64], index: 5, kind: input, shape index: {}]   ;;  %s868_s6 = inlined_call_operand.vmem [shape: f32[4,1], index: 6, kind: input, shape index: {}]   ;;  %s869_s7 = inlined_call_operand.hbm [shape: f32[4,8], index: 7, kind: output, shape index: {}]  }
   0x1   :  { %v35_v0 = vld [vmem:[%s862_s0] sm:$0xff]  ;;  %v28_v2 = vld [vmem:[%s863_s1 + $0x8] sm:$0xff]  ;;  %v29_v3 = vld [vmem:[%s863_s1 + $0x10] sm:$0xff]  ;;  %657 = vset.pattern.permute.xlu0 %v683_v4  ;;  %658 = vset.pattern.permute.xlu1 %v683_v4 }
   0x2   :  { %v27_v1 = vld [vmem:[%s863_s1] sm:$0xff]  ;;  %563 = vmatprep.subr.mxu0 %v35_v0  ;;  %v38_v6 = vld [vmem:[%s864_s2 + $0x10] sm:$0xff]  ;;  %v30_v7 = vld [vmem:[%s863_s1 + $0x18] sm:$0xff] }
   0x3   :  { %565 = vmatprep.mubr.msk.f32.mxu0 %vm84_vm0, %v27_v1  ;;  %564 = vmatpush3.msra.mxu0 %v35_v0  ;;  %v36_v5 = vld [vmem:[%s864_s2] sm:$0xff]  ;;  %v37_v9 = vld [vmem:[%s864_s2 + $0x8] sm:$0xff]  ;;  %v39_v10 = vld [vmem:[%s864_s2 + $0x18] sm:$0xff] }
   0x4   :  { %566 = vmatmul.mubr.msk.f32.vlgmr.msra.gmra.mrb[0].mxu0 %vm84_vm0, %v28_v2  ;;  %46 = vperm.xlu0 %657, %v36_v5   ;;  %v31_v8 = vld [vmem:[%s863_s1 + $0x20] sm:$0xff]  ;;  %v32_v11 = vld [vmem:[%s863_s1 + $0x28] sm:$0xff] }
   0x5   :  { %568 = vmatprep.mubr.msk.f32.mxu0 %vm84_vm0, %v29_v3  ;;  %56 = vperm.xlu1 %658, %v38_v6  }
   0x8   :  { %569 = vmatmul.mubr.msk.f32.gmra.mrb[2].mxu0 %vm84_vm0, %v30_v7  ;;  %51 = vperm.xlu0 %657, %v37_v9  }
   0x9   :  { %571 = vmatprep.mubr.msk.f32.mxu0 %vm84_vm0, %v31_v8 }
   0xa   :  { %12 = vsyncpa [#allocation3], 0  ;;  %v33_v12 = vld [vmem:[%s863_s1 + $0x30] sm:$0xff]  ;;  %v40_v13 = vld [vmem:[%s864_s2 + $0x20] sm:$0xff]  ;;  %61 = vperm.xlu1 %658, %v39_v10   ;;  %vm278_vm1 = vcmask 523264   ;;  %v684_v7 = vmov 0.0|0.0  }
   0xb   :  { %v41_v14 = vld [vmem:[%s864_s2 + $0x28] sm:$0xff]  ;;  %v34_v15 = vld [vmem:[%s863_s1 + $0x38] sm:$0xff]  ;;  %v42_v16 = vld [vmem:[%s864_s2 + $0x30] sm:$0xff]  ;;  %640 = vmatprep.subr.bf16.mxu0 %v684_v7  ;;  %vm685_vm2 = vmmov 0   ;;  %v686_v8 = vmov 0.0   ;;  %vm496_vm3 = vcmask 60416  }
   0xc   :  { %572 = vmatmul.mubr.msk.f32.gmra.mrb[4].mxu0 %vm84_vm0, %v32_v11  ;;  %66 = vperm.xlu0 %657, %v40_v13   ;;  %v43_v17 = vld [vmem:[%s864_s2 + $0x38] sm:$0xff]  ;;  %v230_v18 = vld [vmem:[%s866_s4] sm:$0xff]  ;;  %v231_v19 = vld [vmem:[%s866_s4 + $0x8] sm:$0xff]  ;;  %s687_s2 = smov [#allocation2]  }
   0xd   :  { %574 = vmatprep.mubr.msk.f32.mxu0 %vm84_vm0, %v33_v12  ;;  %v232_v20 = vld [vmem:[%s866_s4 + $0x10] sm:$0xff]  ;;  %v233_v21 = vld [vmem:[%s866_s4 + $0x18] sm:$0xff]  ;;  %v234_v22 = vld [vmem:[%s866_s4 + $0x20] sm:$0xff]  ;;  %s504_s16 = sshll.u32 %s687_s2, 4  ;;  %s505_s16 = int_to_ptr.vmem [resolvable:$true] %s504_s16 }
   0xe   :  { %71 = vperm.xlu1 %658, %v41_v14   ;;  %v235_v23 = vld [vmem:[%s866_s4 + $0x28] sm:$0xff]  ;;  %v236_v24 = vld [vmem:[%s866_s4 + $0x30] sm:$0xff]  ;;  %v237_v25 = vld [vmem:[%s866_s4 + $0x38] sm:$0xff]  ;;  %s659_s17 = scalar_lea.vmem %s505_s16, 64  ;;  %p664_p1 = scmp.lt.s32.totalorder %s505_s16, %s505_s16 }
   0xf   :  { %v417_v26 = vld [vmem:[%s868_s6] sm:$0xf]  ;;  %v223_v0 = vld [vmem:[%s865_s3 + $0x8] sm:$0xff]  ;;  %v224_v1 = vld [vmem:[%s865_s3 + $0x10] sm:$0xff]  ;;  %p660_p0 = scmp.ne.s32.totalorder %s505_s16, %s659_s17  ;;  %p665_p2 = scmp.lt.s32.totalorder %s659_s17, %s659_s17 }
  0x10   :  { %575 = vmatmul.mubr.msk.f32.gmra.mrb[6].mxu0 %vm84_vm0, %v34_v15  ;;  %76 = vperm.xlu0 %657, %v42_v16   ;;  %v222_v27 = vld [vmem:[%s865_s3] sm:$0xff]  ;;  %v225_v2 = vld [vmem:[%s865_s3 + $0x18] sm:$0xff]  ;;  %v227_v4 = vld [vmem:[%s865_s3 + $0x28] sm:$0xff] }
  0x11   :  { %593 = vmatprep.mubr.msk.f32.mxu1 %vm278_vm1, %v222_v27  ;;  %v226_v3 = vld [vmem:[%s865_s3 + $0x20] sm:$0xff]  ;;  %v228_v5 = vld [vmem:[%s865_s3 + $0x30] sm:$0xff]  ;;  %v229_v6 = vld [vmem:[%s865_s3 + $0x38] sm:$0xff]  ;;  %621 = vmatprep.mubr.msk.f32.mxu0 %vm685_vm2, %v686_v8  ;;  %p666_p3 = por %p665_p2, %p664_p1 }
  0x12   :  { %81 = vperm.xlu1 %658, %v43_v17  }
  0x13   :  { %p667_p4 = pnand %p666_p3, %p660_p0 }
  0x14   :  { %240 = vperm.xlu0 %657, %v230_v18  }
  0x16   :  { %245 = vperm.xlu1 %658, %v231_v19  }
  0x18   :  { %250 = vperm.xlu0 %657, %v232_v20  }
  0x1a   :  { %255 = vperm.xlu1 %658, %v233_v21  }
  0x1c   :  { %260 = vperm.xlu0 %657, %v234_v22  }
  0x1e   :  { %265 = vperm.xlu1 %658, %v235_v23  }
  0x20   :  { %270 = vperm.xlu0 %657, %v236_v24  }
  0x22   :  { %275 = vperm.xlu1 %658, %v237_v25  }
  0x24   :  { %420 = vperm.xlu0 %657, %v417_v26  }
  0x83   :  { %v47_v28 = vpop.permute.xlu0 %46 }
  0x84   :  { %v57_v29 = vpop.permute.xlu1 %56 }
  0x87   :  { %v52_v30 = vpop.permute.xlu0 %51 }
  0x89   :  { %v62_v31 = vpop.permute.xlu1 %61 }
  0x8b   :  { %v67_v44 = vpop.permute.xlu0 %66 }
  0x8d   :  { %v72_v41 = vpop.permute.xlu1 %71 }
  0x8f   :  { %v77_v56 = vpop.permute.xlu0 %76 }
  0x91   :  { %v82_v53 = vpop.permute.xlu1 %81 }
  0x93   :  { %v241_v10 = vpop.permute.xlu0 %240 }
  0x95   :  { %v246_v9 = vpop.permute.xlu1 %245 }
  0x97   :  { %v251_v13 = vpop.permute.xlu0 %250 }
  0x99   :  { %v256_v11 = vpop.permute.xlu1 %255 }
  0x9b   :  { %v261_v25 = vpop.permute.xlu0 %260 }
  0x9d   :  { %v266_v22 = vpop.permute.xlu1 %265 }
  0xd7   :  { %v567_v32 = vpop.f32.mrb[0].mxu0 }
  0xd8   :  { %v181_v33 = vadd.f32 %v567_v32, %v52_v30  ;;  %v175_v34 = vpop.f32.mrb[1].mxu0 }
  0xd9   :  { %v176_v35 = vadd.f32 %v175_v34, %v47_v28  ;;  %v276_v34 = vpop.permute.xlu1 %275 }
  0xda   :  { %v215_v36 = vmax.f32 %v181_v33, 0.0 }
  0xdb   :  { %v214_v37 = vmax.f32 %v176_v35, 0.0  ;;  %v570_v38 = vpop.f32.mrb[2].mxu0 }
  0xdc   :  { %v191_v39 = vadd.f32 %v570_v38, %v62_v31  ;;  %v185_v40 = vpop.f32.mrb[3].mxu0 }
  0xdd   :  { %v186_v42 = vadd.f32 %v185_v40, %v57_v29  ;;  %v624_v43 = vpack.c.bf16 %v215_v36, %v214_v37  ;;  %v271_v37 = vpop.permute.xlu0 %270 }
  0xde   :  { %v217_v45 = vmax.f32 %v191_v39, 0.0 }
  0xdf   :  { %v216_v46 = vmax.f32 %v186_v42, 0.0  ;;  %v573_v47 = vpop.f32.mrb[4].mxu0  ;;  %625 = vmatprep.subr.bf16.mxu1 %v624_v43 }
  0xe0   :  { %v201_v48 = vadd.f32 %v573_v47, %v72_v41  ;;  %v195_v49 = vpop.f32.mrb[5].mxu0  ;;  %627 = vmatpush3.bf16.msra.mxu1 %v624_v43 }
  0xe1   :  { %v628_v50 = vpack.c.bf16 %v217_v45, %v216_v46  ;;  %v196_v51 = vadd.f32 %v195_v49, %v67_v44  ;;  %v416_v45 = vld [vmem:[%s867_s5] sm:$0xf]  ;;  %v421_v46 = vpop.permute.xlu0 %420 }
  0xe2   :  { %v219_v52 = vmax.f32 %v201_v48, 0.0 }
  0xe3   :  { %v218_v54 = vmax.f32 %v196_v51, 0.0  ;;  %v576_v55 = vpop.f32.mrb[6].mxu0  ;;  %629 = vmatprep.subr.bf16.mxu1 %v628_v50 }
  0xe4   :  { %v211_v57 = vadd.f32 %v576_v55, %v82_v53  ;;  %v205_v58 = vpop.f32.mrb[7].mxu0  ;;  %631 = vmatpush3.bf16.msra.mxu1 %v628_v50 }
  0xe5   :  { %v632_v59 = vpack.c.bf16 %v219_v52, %v218_v54  ;;  %v206_v60 = vadd.f32 %v205_v58, %v77_v56 }
  0xe6   :  { %v221_v61 = vmax.f32 %v211_v57, 0.0 }
  0xe7   :  { %v220_v62 = vmax.f32 %v206_v60, 0.0  ;;  %633 = vmatprep.subr.bf16.mxu1 %v632_v59 }
  0xe8   :  { %635 = vmatpush3.bf16.msra.mxu1 %v632_v59 }
  0xe9   :  { %v636_v63 = vpack.c.bf16 %v221_v61, %v220_v62 }
  0xeb   :  { %637 = vmatprep.subr.bf16.mxu1 %v636_v63 }
  0xec   :  { %639 = vmatpush3.bf16.msra.mxu1 %v636_v63 }
  0xef   :  { %594 = vmatmul.mubr.msk.f32.vlgmr.msra.gmra.mrb[0].mxu1 %vm278_vm1, %v223_v0 }
  0xf0   :  { %596 = vmatprep.mubr.msk.f32.mxu1 %vm278_vm1, %v224_v1 }
  0xf3   :  { %597 = vmatmul.mubr.msk.f32.gmra.mrb[2].mxu1 %vm278_vm1, %v225_v2 }
  0xf4   :  { %599 = vmatprep.mubr.msk.f32.mxu1 %vm278_vm1, %v226_v3 }
  0xf7   :  { %600 = vmatmul.mubr.msk.f32.gmra.mrb[4].mxu1 %vm278_vm1, %v227_v4 }
  0xf8   :  { %602 = vmatprep.mubr.msk.f32.mxu1 %vm278_vm1, %v228_v5 }
  0xfb   :  { %603 = vmatmul.mubr.msk.f32.gmra.mrb[6].mxu1 %vm278_vm1, %v229_v6 }
 0x1c2   :  { %v595_v12 = vpop.f32.mrb[0].mxu1 }
 0x1c3   :  { %v375_v14 = vadd.f32 %v595_v12, %v246_v9  ;;  %v369_v15 = vpop.f32.mrb[1].mxu1 }
 0x1c4   :  { %v370_v16 = vadd.f32 %v369_v15, %v241_v10 }
 0x1c5   :  { %v409_v17 = vmax.f32 %v375_v14, 0.0 }
 0x1c6   :  { %v408_v18 = vmax.f32 %v370_v16, 0.0  ;;  %v598_v19 = vpop.f32.mrb[2].mxu1 }
 0x1c7   :  { %v385_v20 = vadd.f32 %v598_v19, %v256_v11  ;;  %v379_v21 = vpop.f32.mrb[3].mxu1 }
 0x1c8   :  { %v641_v23 = vpack.c.bf16 %v409_v17, %v408_v18  ;;  %v380_v24 = vadd.f32 %v379_v21, %v251_v13 }
 0x1c9   :  { %v411_v26 = vmax.f32 %v385_v20, 0.0 }
 0x1ca   :  { %v410_v27 = vmax.f32 %v380_v24, 0.0  ;;  %v601_v28 = vpop.f32.mrb[4].mxu1  ;;  %642 = vmatpush3.bf16.msra.mxu0 %v641_v23 }
 0x1cb   :  { %v395_v29 = vadd.f32 %v601_v28, %v266_v22  ;;  %v389_v30 = vpop.f32.mrb[5].mxu1  ;;  %643 = vmatprep.subr.bf16.mxu0 %v684_v7 }
 0x1cc   :  { %v644_v31 = vpack.c.bf16 %v411_v26, %v410_v27  ;;  %v390_v32 = vadd.f32 %v389_v30, %v261_v25 }
 0x1cd   :  { %v413_v33 = vmax.f32 %v395_v29, 0.0 }
 0x1ce   :  { %v412_v35 = vmax.f32 %v390_v32, 0.0  ;;  %v604_v36 = vpop.f32.mrb[6].mxu1  ;;  %645 = vmatpush3.bf16.msra.mxu0 %v644_v31 }
 0x1cf   :  { %v405_v38 = vadd.f32 %v604_v36, %v276_v34  ;;  %v399_v39 = vpop.f32.mrb[7].mxu1  ;;  %646 = vmatprep.subr.bf16.mxu0 %v684_v7 }
 0x1d0   :  { %v647_v40 = vpack.c.bf16 %v413_v33, %v412_v35  ;;  %v400_v41 = vadd.f32 %v399_v39, %v271_v37 }
 0x1d1   :  { %v415_v42 = vmax.f32 %v405_v38, 0.0 }
 0x1d2   :  { %v414_v43 = vmax.f32 %v400_v41, 0.0  ;;  %648 = vmatpush3.bf16.msra.mxu0 %v647_v40 }
 0x1d3   :  { %649 = vmatprep.subr.bf16.mxu0 %v684_v7 }
 0x1d4   :  { %v650_v44 = vpack.c.bf16 %v415_v42, %v414_v43 }
 0x1d6   :  { %651 = vmatpush3.bf16.msra.mxu0 %v650_v44 }
 0x1d9   :  { %622 = vmatmul.mubr.msk.f32.vlgmr.msra.gmra.mrb[8].mxu0 %vm278_vm1, %v416_v45 }
 0x2ac   :  { %v492_v47 = vpop.f32.mrb[8].mxu0 }
 0x2ad   :  { %v493_v48 = vadd.f32 %v492_v47, %v421_v46  ;;  %v623_v49 = vpop.f32.mrb[9].mxu0 }
 0x2af   :  { %497 = vst.msk [vmem:[#allocation2] sm:$0xf] %vm496_vm3, %v493_v48 }
 0x2b0   :  { %670 = shalt.err (!%p667_p4)
}
 0x2b1   :  { %s671_s19 = scalar_lea.hbm %s869_s7, 64 }
 0x2b2   :  { %p672_p5 = scmp.ne.s32.totalorder %s869_s7, %s671_s19  ;;  %p675_p6 = scmp.lt.u32.totalorder %s671_s19, %s869_s7 }
 0x2b4   :  { %p677_p7 = pnand %p675_p6, %p672_p5 }
 0x2b6   :  { %680 = shalt.err (!%p677_p7)
}
 0x2b7   :  { %507 = dma.vmem_to_hbm [thread:$0]  %s505_s16, 64, %s869_s7, [#allocation3]  }
 0x2b8   :  { %681 = dma.done.wait [#allocation3], 64  }
 0x2b9   :  { %682 = vsyncadd [#allocation3], 4294967232 }
 0x2ba   :  { %511 = vsyncpa [#allocation3], 1 }

</bundles_post_ra>
